<compile_context>
chip_gen: v7x
topology: tpu7x:2x2x1
jax: 0.10.0
libtpu: 0.0.40
codegen_flags: <defaults>
</compile_context>

<pallas_src>
import functools

import jax
import jax.numpy as jnp
from jax.experimental import pallas as pl
from jax.experimental.pallas import tpu as pltpu

NOISE_SCALE = 0.05
MASK_FILL = -9999.0


def _round_up(x, m):
    return (x + m - 1) // m * m


# --------------------------------------------------------------------------
# Kernel 1: scoring  (x + 0.05 * noise) @ W^T + b
# --------------------------------------------------------------------------
def _score_kernel(x_ref, noise_ref, w_ref, b_ref, o_ref):
    xn = x_ref[...].astype(jnp.float32) + NOISE_SCALE * noise_ref[...].astype(jnp.float32)
    w = w_ref[...].astype(jnp.float32)                       # (1, D)
    s = jnp.sum(xn * w, axis=-1, keepdims=True)              # (tile, 1)
    o_ref[...] = (s + b_ref[...]).astype(o_ref.dtype)


def _score_pallas(x, noise, weight, bias, *, node_tile=1024):
    N, D = x.shape
    tile = min(node_tile, _round_up(N, 8))
    n_pad = _round_up(N, tile)
    if n_pad != N:
        pad = ((0, n_pad - N), (0, 0))
        x = jnp.pad(x, pad)
        noise = jnp.pad(noise, pad)
    w2 = weight.reshape(1, D).astype(jnp.float32)
    b2 = bias.reshape(1, 1).astype(jnp.float32)

    out = pl.pallas_call(
        _score_kernel,
        out_shape=jax.ShapeDtypeStruct((n_pad, 1), jnp.float32),
        grid_spec=pltpu.PrefetchScalarGridSpec(
            num_scalar_prefetch=0,
            grid=(n_pad // tile,),
            in_specs=[
                pl.BlockSpec((tile, D), lambda i: (i, 0)),
                pl.BlockSpec((tile, D), lambda i: (i, 0)),
                pl.BlockSpec((1, D), lambda i: (0, 0)),
                pl.BlockSpec((1, 1), lambda i: (0, 0)),
            ],
            out_specs=pl.BlockSpec((tile, 1), lambda i: (i, 0)),
        ),
        compiler_params=pltpu.CompilerParams(
            dimension_semantics=("parallel",),
            vmem_limit_bytes=32 * 1024 * 1024,
        ),
    )(x, noise, w2, b2)
    return out[:N, 0]


# --------------------------------------------------------------------------
# Kernel 2: pairwise masked softmax, emitted already transposed: out[b,j,i]
# --------------------------------------------------------------------------
def _perm_kernel(sd_ref, ssd_ref, mrow_ref, mcol_ref, out_ref, *, tau):
    sd = sd_ref[...].astype(jnp.float32)      # (bt, 1, n)  original scores (i on lanes)
    ssd = ssd_ref[...].astype(jnp.float32)    # (bt, n, 1)  sorted scores   (j on sublanes)
    mrow = mrow_ref[...]                      # (bt, 1, n)  mask over i
    mcol = mcol_ref[...]                      # (bt, n, 1)  mask over j

    madj = mcol * mrow                                        # (bt, n, n)
    pd = -jnp.abs(sd - ssd) * (1.0 / tau)                     # pd[b,j,i] = -|sd_i - ssd_j|/tau
    pd = jnp.where(madj > 0.5, pd, MASK_FILL)

    # torch softmax(dim=-1) over j  ==  softmax over axis=-2 here (transposed).
    m = jnp.max(pd, axis=-2, keepdims=True)                   # (bt, 1, n)
    e = jnp.exp(pd - m)
    denom = jnp.sum(e, axis=-2, keepdims=True)                # (bt, 1, n)
    inv = pl.reciprocal(denom)                                # exact; one per column
    soft = e * inv
    out_ref[...] = (madj * soft).astype(out_ref.dtype)


def _pick_batch_tile(num_graphs, n_pad, vmem_budget=8 * 1024 * 1024):
    per_b = n_pad * n_pad * 4 * 2                 # double-buffered f32 output block
    bt = max(1, min(num_graphs, vmem_budget // max(per_b, 1)))
    if num_graphs >= 2:                           # keep >= 2 grid steps (v7x: 2 TCs)
        bt = min(bt, max(1, num_graphs // 2))
    while num_graphs % bt != 0:
        bt -= 1
    return bt


def _perm_pallas(scores_dense, scores_sorted_dense, mask_f, *, tau, batch_tile=None):
    B, n = scores_dense.shape
    # lane-dense output: pad node dim to 128 when it is large, else to 8.
    n_pad = _round_up(n, 128) if n >= 128 else _round_up(n, 8)
    if n_pad != n:
        pad = ((0, 0), (0, n_pad - n))
        scores_dense = jnp.pad(scores_dense, pad)
        scores_sorted_dense = jnp.pad(scores_sorted_dense, pad)
        mask_f = jnp.pad(mask_f, pad)

    sd = scores_dense.reshape(B, 1, n_pad).astype(jnp.float32)
    ssd = scores_sorted_dense.reshape(B, n_pad, 1).astype(jnp.float32)
    mrow = mask_f.reshape(B, 1, n_pad).astype(jnp.float32)
    mcol = mask_f.reshape(B, n_pad, 1).astype(jnp.float32)

    bt = _pick_batch_tile(B, n_pad) if batch_tile is None else batch_tile
    grid = (B // bt,)
    kernel = functools.partial(_perm_kernel, tau=float(tau))

    out = pl.pallas_call(
        kernel,
        out_shape=jax.ShapeDtypeStruct((B, n_pad, n_pad), jnp.float32),
        grid_spec=pltpu.PrefetchScalarGridSpec(
            num_scalar_prefetch=0,
            grid=grid,
            in_specs=[
                pl.BlockSpec((bt, 1, n_pad), lambda i: (i, 0, 0)),
                pl.BlockSpec((bt, n_pad, 1), lambda i: (i, 0, 0)),
                pl.BlockSpec((bt, 1, n_pad), lambda i: (i, 0, 0)),
                pl.BlockSpec((bt, n_pad, 1), lambda i: (i, 0, 0)),
            ],
            out_specs=pl.BlockSpec((bt, n_pad, n_pad), lambda i: (i, 0, 0)),
        ),
        compiler_params=pltpu.CompilerParams(
            dimension_semantics=("parallel",),
            vmem_limit_bytes=32 * 1024 * 1024,
        ),
    )(sd, ssd, mrow, mcol)
    return out


# --------------------------------------------------------------------------
# Full forward (Permuter.forward), hard=False
# --------------------------------------------------------------------------
def permuter_forward(node_features, batch, weight, bias, noise, *,
                     num_graphs, max_nodes, tau=1.0, hard=False, node_tile=1024):
    """node_features: (N, D); batch: (N,) sorted graph ids; returns (B, n, n) = perm^T."""
    if hard:
        # TODO(synk): hard (straight-through one-hot / topk scatter) path not implemented.
        raise NotImplementedError("hard=True path not implemented")
    N, _ = node_features.shape

    # 1) noisy scoring (Pallas).
    scores = _score_pallas(node_features, noise, weight, bias, node_tile=node_tile)  # (N,)

    # 2) sparse_sort + to_dense_batch equivalent (jnp glue; assumes `batch` sorted,
    #    as torch_geometric's to_dense_batch does).
    # TODO(synk): data-dependent sort/scatter have no Pallas primitive; done with jnp.
    counts = jnp.bincount(batch, length=num_graphs)
    ptr = jnp.concatenate(
        [jnp.zeros((1,), jnp.int32), jnp.cumsum(counts).astype(jnp.int32)])
    pos = jnp.arange(N, dtype=jnp.int32) - ptr[batch]
    sd = jnp.zeros((num_graphs, max_nodes), jnp.float32).at[batch, pos].set(scores)
    mask = jnp.zeros((num_graphs, max_nodes), jnp.bool_).at[batch, pos].set(True)
    sorted_rows = jnp.sort(jnp.where(mask, sd, jnp.inf), axis=-1)  # per-graph ascending
    ssd = jnp.where(mask, sorted_rows, 0.0)

    # 3) pairwise masked softmax permutation matrix, already transposed (Pallas).
    perm_t = _perm_pallas(sd, ssd, mask.astype(jnp.float32), tau=tau)
    return perm_t[:, :max_nodes, :max_nodes]


# --------------------------------------------------------------------------
# Pure-JAX reference mirroring the PyTorch code path
# --------------------------------------------------------------------------
def _reference(node_features, noise, weight, bias, batch, num_graphs, max_nodes, tau=1.0):
    nf = node_features + NOISE_SCALE * noise
    scores = (nf @ weight.T + bias).reshape(-1)                       # Linear(D,1) + squeeze
    # sparse_sort (descending=False)
    f_min, f_max = scores.min(), scores.max()
    norm = (scores - f_min) / (f_max - f_min + 1e-12) + batch.astype(scores.dtype)
    perm_idx = jnp.argsort(norm)
    scores_sorted = scores[perm_idx]
    # to_dense_batch
    counts = jnp.bincount(batch, length=num_graphs)
    ptr = jnp.concatenate(
        [jnp.zeros((1,), jnp.int32), jnp.cumsum(counts).astype(jnp.int32)])
    pos = jnp.arange(scores.shape[0], dtype=jnp.int32) - ptr[batch]

    def to_dense(v):
        return jnp.zeros((num_graphs, max_nodes), v.dtype).at[batch, pos].set(v)

    sd = to_dense(scores)
    ssd = to_dense(scores_sorted)
    mask = jnp.zeros((num_graphs, max_nodes), bool).at[batch, pos].set(True)
    mask_adj = mask[:, None, :] & mask[:, :, None]
    pd = -jnp.abs(sd[:, :, None] - ssd[:, None, :]) / tau
    pdm = jnp.where(mask_adj, pd, MASK_FILL)
    perm = jax.nn.softmax(pdm, axis=-1)
    perm = jnp.where(mask_adj, perm, 0.0)
    return jnp.swapaxes(perm, 1, 2)


if __name__ == "__main__":
    D = 32                      # input_dim of scoring_fc
    counts = [7, 8]             # ragged graphs: 7 and 8 nodes
    B = len(counts)
    N = sum(counts)
    n_max = max(counts)
    tau = 1.0

    key = jax.random.PRNGKey(0)
    kx, kn, kw, kb = jax.random.split(key, 4)
    x = jax.random.normal(kx, (N, D), dtype=jnp.float32)
    # noise generated host-side (deterministic) and added in-kernel, mirroring randn_like*0.05
    noise = jax.random.normal(kn, (N, D), dtype=jnp.float32)
    weight = 0.1 * jax.random.normal(kw, (1, D), dtype=jnp.float32)   # Linear(D,1).weight
    bias = 0.1 * jax.random.normal(kb, (1,), dtype=jnp.float32)       # Linear(D,1).bias
    batch = jnp.concatenate(
        [jnp.full((c,), g, dtype=jnp.int32) for g, c in enumerate(counts)])

    perm = jax.block_until_ready(
        permuter_forward(x, batch, weight, bias, noise,
                         num_graphs=B, max_nodes=n_max, tau=tau, hard=False))

    perm_ref = _reference(x, noise, weight, bias, batch, B, n_max, tau)

    assert perm.shape == (B, n_max, n_max)
    assert jnp.allclose(perm, perm_ref, atol=1e-5, rtol=1e-5)

    print("KERNEL_OK")
</pallas_src>

<mosaic_0001>
module attributes {stable_mosaic.version = 11 : i64} {
  func.func @_score_kernel(%arg0: i32, %arg1: memref<16x32xf32, #tpu.memory_space<vmem>>, %arg2: memref<16x32xf32, #tpu.memory_space<vmem>>, %arg3: memref<1x32xf32, #tpu.memory_space<vmem>>, %arg4: memref<1x1xf32, #tpu.memory_space<vmem>>, %arg5: memref<16x1xf32, #tpu.memory_space<vmem>>) attributes {dimension_semantics = [#tpu.dimension_semantics<parallel>], iteration_bounds = array<i64: 1>, scalar_prefetch = 0 : i64, scratch_operands = 0 : i64, tpu.core_type = #tpu.core_type<tc>, window_params = [{transform_indices = @transform_0, window_bounds = array<i64: 16, 32>}, {transform_indices = @transform_1, window_bounds = array<i64: 16, 32>}, {pipeline_mode = #tpu.pipeline_mode<synchronous>, transform_indices = @transform_2, window_bounds = array<i64: 1, 32>}, {pipeline_mode = #tpu.pipeline_mode<synchronous>, transform_indices = @transform_3, window_bounds = array<i64: 1, 1>}, {transform_indices = @transform_4, window_bounds = array<i64: 16, 1>}]} {
    %c0 = arith.constant 0 : index
    %c0_0 = arith.constant 0 : index
    %0 = vector.load %arg1[%c0, %c0_0] : memref<16x32xf32, #tpu.memory_space<vmem>>, vector<16x32xf32>
    %c0_1 = arith.constant 0 : index
    %c0_2 = arith.constant 0 : index
    %1 = vector.load %arg2[%c0_1, %c0_2] : memref<16x32xf32, #tpu.memory_space<vmem>>, vector<16x32xf32>
    %cst = arith.constant 5.000000e-02 : f32
    %2 = vector.broadcast %cst : f32 to vector<16x32xf32>
    %3 = arith.mulf %2, %1 : vector<16x32xf32>
    %4 = arith.addf %0, %3 : vector<16x32xf32>
    %c0_3 = arith.constant 0 : index
    %c0_4 = arith.constant 0 : index
    %5 = vector.load %arg3[%c0_3, %c0_4] : memref<1x32xf32, #tpu.memory_space<vmem>>, vector<1x32xf32>
    %6 = vector.broadcast %5 : vector<1x32xf32> to vector<16x32xf32>
    %7 = arith.mulf %4, %6 : vector<16x32xf32>
    %cst_5 = arith.constant dense<0.000000e+00> : vector<16xf32>
    %8 = vector.multi_reduction <add>, %7, %cst_5 [1] : vector<16x32xf32> to vector<16xf32>
    %9 = vector.shape_cast %8 : vector<16xf32> to vector<16x1xf32>
    %c0_6 = arith.constant 0 : index
    %c0_7 = arith.constant 0 : index
    %10 = vector.load %arg4[%c0_6, %c0_7] : memref<1x1xf32, #tpu.memory_space<vmem>>, vector<1x1xf32>
    %11 = vector.broadcast %10 : vector<1x1xf32> to vector<16x1xf32>
    %12 = arith.addf %9, %11 : vector<16x1xf32>
    %c0_8 = arith.constant 0 : index
    %c0_9 = arith.constant 0 : index
    %13 = vector.load %arg5[%c0_8, %c0_9] : memref<16x1xf32, #tpu.memory_space<vmem>>, vector<16x1xf32>
    tpu.vector_store %arg5[%c0_8, %c0_9], %12 {strides = array<i32>} : memref<16x1xf32, #tpu.memory_space<vmem>>, vector<16x1xf32>,
    return
  }
  func.func @transform_0(%arg0: i32) -> (i32, i32) {
    %c0_i32 = arith.constant 0 : i32
    %c0_i32_0 = arith.constant 0 : i32
    return %arg0, %c0_i32 : i32, i32
  }
  func.func @transform_1(%arg0: i32) -> (i32, i32) {
    %c0_i32 = arith.constant 0 : i32
    %c0_i32_0 = arith.constant 0 : i32
    return %arg0, %c0_i32 : i32, i32
  }
  func.func @transform_2(%arg0: i32) -> (i32, i32) {
    %c0_i32 = arith.constant 0 : i32
    %c0_i32_0 = arith.constant 0 : i32
    %c0_i32_1 = arith.constant 0 : i32
    return %c0_i32, %c0_i32_0 : i32, i32
  }
  func.func @transform_3(%arg0: i32) -> (i32, i32) {
    %c0_i32 = arith.constant 0 : i32
    %c0_i32_0 = arith.constant 0 : i32
    %c0_i32_1 = arith.constant 0 : i32
    return %c0_i32, %c0_i32_0 : i32, i32
  }
  func.func @transform_4(%arg0: i32) -> (i32, i32) {
    %c0_i32 = arith.constant 0 : i32
    %c0_i32_0 = arith.constant 0 : i32
    return %arg0, %c0_i32 : i32, i32
  }
}

</mosaic_0001>

<bundles_post_ra>
// kernel: tpu_custom_call.1
= control target key start
LH: loop header
LB: loop body
LE: loop exit
PB: predicated region body
PF: predicated region fallthrough
CT: control target
= control target key end

     0   :  { %s208_s0 = inlined_call_operand.hbm [shape: f32[16,32], index: 0, kind: input, shape index: {}]   ;;  %s209_s1 = inlined_call_operand.hbm [shape: f32[16,32], index: 1, kind: input, shape index: {}]   ;;  %s210_s2 = inlined_call_operand.vmem [shape: f32[1,32], index: 2, kind: input, shape index: {}]   ;;  %s211_s3 = inlined_call_operand.<no memory space> [shape: f32[1,1], index: 3, kind: input, shape index: {}]   ;;  %s212_s4 = inlined_call_operand.vmem [shape: f32[16,1], index: 4, kind: output, shape index: {}]  }
   0x1   :  { %v9_v0 = vstv %s211_s3 }
   0x2   :  { %10 = vst [vmem:[#allocation2] sm:$0x1] %v9_v0 }
   0x3   :  { %11 = vsyncpa [#allocation4], 0 }
   0x4   :  { %12 = vsyncpa [#allocation6], 0  ;;  %s143_s17 = smov [#allocation3]   ;;  %s95_s21 = scalar_lea.hbm %s208_s0, 256 }
   0x5   :  { %s18_s18 = sshll.u32 %s143_s17, 4  ;;  %p96_p0 = scmp.ne.s32.totalorder %s208_s0, %s95_s21  ;;  %s19_s18 = int_to_ptr.vmem [resolvable:$true] %s18_s18 }
   0x6   :  { %p99_p1 = scmp.lt.u32.totalorder %s95_s21, %s208_s0 }
   0x8   :  { %p101_p2 = pnand %p99_p1, %p96_p0 }
   0xa   :  { %104 = shalt.err (!%p101_p2)
}
   0xb   :  { %s105_s3 = scalar_lea.vmem %s19_s18, 256  ;;  %p110_p4 = scmp.lt.s32.totalorder %s19_s18, %s19_s18 }
   0xc   :  { %p106_p3 = scmp.ne.s32.totalorder %s19_s18, %s105_s3  ;;  %p111_p5 = scmp.lt.s32.totalorder %s105_s3, %s105_s3 }
   0xe   :  { %p112_p6 = por %p111_p5, %p110_p4 }
  0x10   :  { %p113_p7 = pnand %p112_p6, %p106_p3 }
  0x12   :  { %116 = shalt.err (!%p113_p7)
}
  0x13   :  { %s144_s26 = smov 128   ;;  %s145_s27 = smov 8  }
  0x14   :  { %24 = dma.hbm_to_vmem [thread:$0]  %s208_s0, 256, %s19_s18, [#allocation4], %s144_s26, %s144_s26, %s145_s27  }
  0x15   :  { %s146_s30 = smov [#allocation5]   ;;  %s117_s8 = scalar_lea.hbm %s209_s1, 256 }
  0x16   :  { %s30_s5 = sshll.u32 %s146_s30, 4  ;;  %p118_p8 = scmp.ne.s32.totalorder %s209_s1, %s117_s8  ;;  %s31_s5 = int_to_ptr.vmem [resolvable:$true] %s30_s5 }
  0x17   :  { %p121_p9 = scmp.lt.u32.totalorder %s117_s8, %s209_s1 }
  0x19   :  { %p123_p10 = pnand %p121_p9, %p118_p8 }
  0x1b   :  { %126 = shalt.err (!%p123_p10)
}
  0x1c   :  { %s127_s13 = scalar_lea.vmem %s31_s5, 256  ;;  %p132_p12 = scmp.lt.s32.totalorder %s31_s5, %s31_s5 }
  0x1d   :  { %p128_p11 = scmp.ne.s32.totalorder %s31_s5, %s127_s13  ;;  %p133_p13 = scmp.lt.s32.totalorder %s127_s13, %s127_s13 }
  0x1f   :  { %p134_p0 = por %p133_p13, %p132_p12 }
  0x21   :  { %p135_p1 = pnand %p134_p0, %p128_p11 }
  0x23   :  { %138 = shalt.err (!%p135_p1)
}
  0x24   :  { %36 = dma.hbm_to_vmem [thread:$0]  %s209_s1, 256, %s31_s5, [#allocation6], %s144_s26, %s144_s26, %s145_s27  }
  0x25   :  { %139 = dma.done.wait [#allocation4], 256  }
  0x26   :  { %140 = vsyncadd [#allocation4], 4294967040 }
  0x27   :  { %141 = dma.done.wait [#allocation6], 256  }
  0x28   :  { %142 = vsyncadd [#allocation6], 4294967040  ;;  %v47_v1 = vld [vmem:[#allocation3] sm:$0xff]  ;;  %v49_v2 = vld [vmem:[#allocation5] sm:$0xff]  ;;  %vm64_vm0 = vcmask 261120   ;;  %vm80_vm1 = vcmask 7168  }
  0x29   :  { %v51_v3 = vmul.f32 0.05, %v49_v2  ;;  %v48_v4 = vld [vmem:[#allocation3 + $0x8] sm:$0xff]  ;;  %v50_v5 = vld [vmem:[#allocation5 + $0x8] sm:$0xff] }
  0x2a   :  { %v89_v6 = vld [vmem:[%s210_s2] ss:$0 sm:$0xff]  ;;  %v52_v7 = vmul.f32 0.05, %v50_v5 }
  0x2b   :  { %v53_v8 = vadd.f32 %v51_v3, %v47_v1  ;;  %v90_v14 = vld [vmem:[#allocation2] ss:$0 sm:$0xff] }
  0x2c   :  { %v54_v9 = vadd.f32 %v52_v7, %v48_v4 }
  0x2d   :  { %v62_v10 = vmul.f32 %v89_v6, %v53_v8 }
  0x2e   :  { %v63_v11 = vmul.f32 %v89_v6, %v54_v9 }
  0x2f   :  { %v65_v12 = vsel %vm64_vm0, %v62_v10, 0.0 }
  0x30   :  { %66 = vadd.xlane.f32.xlu0 %v65_v12  ;;  %v68_v13 = vsel %vm64_vm0, %v63_v11, 0.0 }
  0x34   :  { %69 = vadd.xlane.f32.xlu0 %v68_v13 }
  0xbd   :  { %v67_v15 = vpop.xlane.xlu0 %66 }
  0xbe   :  { %v78_v16 = vadd.f32 %v90_v14, %v67_v15 }
  0xc0   :  { %81 = vst.msk [vmem:[%s212_s4] sm:$0xff] %vm80_vm1, %v78_v16 }
  0xc1   :  { %v70_v17 = vpop.xlane.xlu0 %69 }
  0xc2   :  { %v79_v18 = vadd.f32 %v90_v14, %v70_v17 }
  0xc4   :  { %82 = vst.msk [vmem:[%s212_s4 + $0x8] sm:$0xff] %vm80_vm1, %v79_v18 }
  0xc5   :  { %87 = vsyncpa [#allocation4], 1 }
  0xc6   :  { %88 = vsyncpa [#allocation6], 1 }

</bundles_post_ra>
